<compile_context>
chip_gen: v7x
topology: tpu7x:2x2x1
jax: 0.10.0
libtpu: 0.0.40
codegen_flags: <defaults>
</compile_context>

<pallas_src>
import math

import jax
import jax.numpy as jnp
from jax.experimental import pallas as pl
from jax.experimental.pallas import tpu as pltpu

DT = 0.1
IN_F, HID_F, OUT_F = 3, 10, 3

# Packed-parameter layout (single 1-D f32 SMEM vector):
OFF_W1 = 0                               # w1 (3,10) row-major: w1[i,j] = P[i*10+j]
OFF_B1 = OFF_W1 + IN_F * HID_F           # 30: b1 (10,)
OFF_W2 = OFF_B1 + HID_F                  # 40: w2 (10,3) row-major: w2[k,j] = P[40+k*3+j]
OFF_B2 = OFF_W2 + HID_F * OUT_F          # 70: b2 (3,)
OFF_SIGMA = OFF_B2 + OUT_F               # 73: sigma, 74: rho, 75: beta
N_PARAMS = OFF_SIGMA + 3                 # 76


def _tree_sum(terms):
    # Pairwise reduction: depth O(log n) instead of a serial add chain.
    while len(terms) > 1:
        nxt = [terms[i] + terms[i + 1] for i in range(0, len(terms) - 1, 2)]
        if len(terms) % 2:
            nxt.append(terms[-1])
        terms = nxt
    return terms[0]


def _lorenz(a, b, c, sigma, rho, beta):
    # a, b, c are (1, 1) f32 arrays (first batch column), matching PyTorch's
    # r[0,0], r[1,0], r[2,0] reads of r.T.
    ka = sigma * (b - a)
    kb = rho * a - b - a * c
    kc = a * b - beta * c
    return ka, kb, kc


def net_kernel(xT_ref, p_ref, out_ref):
    # xT_ref: (3, B) f32 in VMEM (feature-major, batch on lanes)
    # p_ref : (76,)  f32 in SMEM (packed weights + Lorenz params)
    # out_ref: (3, B) f32 in VMEM
    def P(i):
        return p_ref[i]

    x_rows = [xT_ref[i:i + 1, :] for i in range(IN_F)]        # each (1, B)

    # fc1 + relu : h_j = relu(b1[j] + sum_i w1[i,j] * x_i)
    h_rows = []
    for j in range(HID_F):
        terms = [P(OFF_W1 + i * HID_F + j) * x_rows[i] for i in range(IN_F)]
        s = _tree_sum(terms) + P(OFF_B1 + j)
        h_rows.append(jnp.maximum(s, jnp.float32(0.0)))        # (1, B)

    # fc2 : y_j = b2[j] + sum_k w2[k,j] * h_k   (tree-summed)
    y_rows = []
    for j in range(OUT_F):
        terms = [P(OFF_W2 + k * OUT_F + j) * h_rows[k] for k in range(HID_F)]
        y_rows.append(_tree_sum(terms) + P(OFF_B2 + j))        # (1, B)

    sigma = P(OFF_SIGMA)
    rho = P(OFF_SIGMA + 1)
    beta = P(OFF_SIGMA + 2)
    dt = jnp.float32(DT)

    # RK4 increment depends only on the first batch element's output.
    r = [y_rows[j][0:1, 0:1] for j in range(OUT_F)]            # each (1, 1)
    k1 = _lorenz(r[0], r[1], r[2], sigma, rho, beta)
    k2 = _lorenz(r[0] + dt * k1[0] / 2, r[1] + dt * k1[1] / 2,
                 r[2] + dt * k1[2] / 2, sigma, rho, beta)
    k3 = _lorenz(r[0] + dt * k2[0] / 2, r[1] + dt * k2[1] / 2,
                 r[2] + dt * k2[2] / 2, sigma, rho, beta)
    k4 = _lorenz(r[0] + dt * k3[0], r[1] + dt * k3[1],
                 r[2] + dt * k3[2], sigma, rho, beta)

    # Output is already transposed (3, B): per-row scalar add of the increment,
    # broadcast over the whole batch exactly like `r.T + dt*(...)/6` in PyTorch.
    for j in range(OUT_F):
        inc = dt * (k1[j] + 2.0 * k2[j] + 2.0 * k3[j] + k4[j]) / 6.0   # (1, 1)
        out_ref[j:j + 1, :] = y_rows[j] + inc


def pack_params(w1, b1, w2, b2, sigma, rho, beta):
    """w1: (3,10), b1: (10,), w2: (10,3), b2: (3,) -> single f32[76] vector."""
    return jnp.concatenate([
        jnp.asarray(w1, jnp.float32).reshape(-1),
        jnp.asarray(b1, jnp.float32).reshape(-1),
        jnp.asarray(w2, jnp.float32).reshape(-1),
        jnp.asarray(b2, jnp.float32).reshape(-1),
        jnp.asarray([sigma, rho, beta], jnp.float32),
    ])


def net_forward(x, params):
    """x: (B, 3) f32, params: (76,) f32 -> (3, B) f32 (same as PyTorch rk4 output)."""
    B = x.shape[0]
    xT = x.T  # (3, B): one tiny transpose on input; output needs none.
    vmem = pl.BlockSpec(memory_space=pltpu.MemorySpace.VMEM)
    smem = pl.BlockSpec(memory_space=pltpu.MemorySpace.SMEM)
    return pl.pallas_call(
        net_kernel,
        out_shape=jax.ShapeDtypeStruct((OUT_F, B), jnp.float32),
        in_specs=[vmem, smem],
        out_specs=vmem,
    )(xT, params)


def net_reference(x, w1, b1, w2, b2, sigma=1.0, rho=1.0, beta=1.0):
    # Pure-JAX reference mirroring the PyTorch forward.
    h = jnp.maximum(x @ w1 + b1, 0.0)
    y = h @ w2 + b2                     # (B, 3)

    def lorenz(r):
        return jnp.stack([sigma * (r[1] - r[0]),
                          rho * r[0] - r[1] - r[0] * r[2],
                          r[0] * r[1] - beta * r[2]])

    r = y[0]
    k1 = lorenz(r)
    k2 = lorenz(r + DT * k1 / 2)
    k3 = lorenz(r + DT * k2 / 2)
    k4 = lorenz(r + DT * k3)
    delta = DT * (k1 + 2 * k2 + 2 * k3 + k4) / 6
    return y.T + delta[:, None]


if __name__ == "__main__":
    key = jax.random.PRNGKey(0)
    kx, kw1, kb1, kw2, kb2 = jax.random.split(key, 5)

    # PyTorch Linear-style uniform init bounds; weights stored pre-transposed
    # as (in_features, out_features).
    bound1 = 1.0 / math.sqrt(IN_F)
    bound2 = 1.0 / math.sqrt(HID_F)
    w1 = jax.random.uniform(kw1, (IN_F, HID_F), jnp.float32, -bound1, bound1)
    b1 = jax.random.uniform(kb1, (HID_F,), jnp.float32, -bound1, bound1)
    w2 = jax.random.uniform(kw2, (HID_F, OUT_F), jnp.float32, -bound2, bound2)
    b2 = jax.random.uniform(kb2, (OUT_F,), jnp.float32, -bound2, bound2)
    # sigma, rho, beta initialized to 1.0 as in the module's __init__.
    params = pack_params(w1, b1, w2, b2, 1.0, 1.0, 1.0)

    B = 2
    x = jax.random.normal(kx, (B, IN_F), dtype=jnp.float32)

    out = jax.jit(net_forward)(x, params)
    out = jax.block_until_ready(out)

    ref = net_reference(x, w1, b1, w2, b2)
    assert out.shape == (OUT_F, B), out.shape
    assert jnp.allclose(out, ref, rtol=1e-4, atol=1e-4), (out, ref)

    print("KERNEL_OK")
</pallas_src>

<mosaic_0001>
module attributes {stable_mosaic.version = 11 : i64} {
  func.func @net_kernel(%arg0: memref<3x2xf32, #tpu.memory_space<vmem>>, %arg1: memref<76xf32, #tpu.memory_space<smem>>, %arg2: memref<3x2xf32, #tpu.memory_space<vmem>>) attributes {dimension_semantics = [], scalar_prefetch = 0 : i64, scratch_operands = 0 : i64, tpu.core_type = #tpu.core_type<tc>} {
    %c0 = arith.constant 0 : index
    %c0_0 = arith.constant 0 : index
    %0 = vector.load %arg0[%c0, %c0_0] : memref<3x2xf32, #tpu.memory_space<vmem>>, vector<1x2xf32>
    %c1 = arith.constant 1 : index
    %c0_1 = arith.constant 0 : index
    %1 = vector.load %arg0[%c1, %c0_1] : memref<3x2xf32, #tpu.memory_space<vmem>>, vector<1x2xf32>
    %c2 = arith.constant 2 : index
    %c0_2 = arith.constant 0 : index
    %2 = vector.load %arg0[%c2, %c0_2] : memref<3x2xf32, #tpu.memory_space<vmem>>, vector<1x2xf32>
    %c0_3 = arith.constant 0 : index
    %3 = memref.load %arg1[%c0_3] : memref<76xf32, #tpu.memory_space<smem>>
    %4 = vector.broadcast %3 : f32 to vector<1x2xf32>
    %5 = arith.mulf %4, %0 : vector<1x2xf32>
    %c10 = arith.constant 10 : index
    %6 = memref.load %arg1[%c10] : memref<76xf32, #tpu.memory_space<smem>>
    %7 = vector.broadcast %6 : f32 to vector<1x2xf32>
    %8 = arith.mulf %7, %1 : vector<1x2xf32>
    %c20 = arith.constant 20 : index
    %9 = memref.load %arg1[%c20] : memref<76xf32, #tpu.memory_space<smem>>
    %10 = vector.broadcast %9 : f32 to vector<1x2xf32>
    %11 = arith.mulf %10, %2 : vector<1x2xf32>
    %12 = arith.addf %5, %8 : vector<1x2xf32>
    %13 = arith.addf %12, %11 : vector<1x2xf32>
    %c30 = arith.constant 30 : index
    %14 = memref.load %arg1[%c30] : memref<76xf32, #tpu.memory_space<smem>>
    %15 = vector.broadcast %14 : f32 to vector<1x2xf32>
    %16 = arith.addf %13, %15 : vector<1x2xf32>
    %cst = arith.constant 0.000000e+00 : f32
    %17 = vector.broadcast %cst : f32 to vector<1x2xf32>
    %18 = arith.maximumf %16, %17 : vector<1x2xf32>
    %c1_4 = arith.constant 1 : index
    %19 = memref.load %arg1[%c1_4] : memref<76xf32, #tpu.memory_space<smem>>
    %20 = vector.broadcast %19 : f32 to vector<1x2xf32>
    %21 = arith.mulf %20, %0 : vector<1x2xf32>
    %c11 = arith.constant 11 : index
    %22 = memref.load %arg1[%c11] : memref<76xf32, #tpu.memory_space<smem>>
    %23 = vector.broadcast %22 : f32 to vector<1x2xf32>
    %24 = arith.mulf %23, %1 : vector<1x2xf32>
    %c21 = arith.constant 21 : index
    %25 = memref.load %arg1[%c21] : memref<76xf32, #tpu.memory_space<smem>>
    %26 = vector.broadcast %25 : f32 to vector<1x2xf32>
    %27 = arith.mulf %26, %2 : vector<1x2xf32>
    %28 = arith.addf %21, %24 : vector<1x2xf32>
    %29 = arith.addf %28, %27 : vector<1x2xf32>
    %c31 = arith.constant 31 : index
    %30 = memref.load %arg1[%c31] : memref<76xf32, #tpu.memory_space<smem>>
    %31 = vector.broadcast %30 : f32 to vector<1x2xf32>
    %32 = arith.addf %29, %31 : vector<1x2xf32>
    %cst_5 = arith.constant 0.000000e+00 : f32
    %33 = vector.broadcast %cst_5 : f32 to vector<1x2xf32>
    %34 = arith.maximumf %32, %33 : vector<1x2xf32>
    %c2_6 = arith.constant 2 : index
    %35 = memref.load %arg1[%c2_6] : memref<76xf32, #tpu.memory_space<smem>>
    %36 = vector.broadcast %35 : f32 to vector<1x2xf32>
    %37 = arith.mulf %36, %0 : vector<1x2xf32>
    %c12 = arith.constant 12 : index
    %38 = memref.load %arg1[%c12] : memref<76xf32, #tpu.memory_space<smem>>
    %39 = vector.broadcast %38 : f32 to vector<1x2xf32>
    %40 = arith.mulf %39, %1 : vector<1x2xf32>
    %c22 = arith.constant 22 : index
    %41 = memref.load %arg1[%c22] : memref<76xf32, #tpu.memory_space<smem>>
    %42 = vector.broadcast %41 : f32 to vector<1x2xf32>
    %43 = arith.mulf %42, %2 : vector<1x2xf32>
    %44 = arith.addf %37, %40 : vector<1x2xf32>
    %45 = arith.addf %44, %43 : vector<1x2xf32>
    %c32 = arith.constant 32 : index
    %46 = memref.load %arg1[%c32] : memref<76xf32, #tpu.memory_space<smem>>
    %47 = vector.broadcast %46 : f32 to vector<1x2xf32>
    %48 = arith.addf %45, %47 : vector<1x2xf32>
    %cst_7 = arith.constant 0.000000e+00 : f32
    %49 = vector.broadcast %cst_7 : f32 to vector<1x2xf32>
    %50 = arith.maximumf %48, %49 : vector<1x2xf32>
    %c3 = arith.constant 3 : index
    %51 = memref.load %arg1[%c3] : memref<76xf32, #tpu.memory_space<smem>>
    %52 = vector.broadcast %51 : f32 to vector<1x2xf32>
    %53 = arith.mulf %52, %0 : vector<1x2xf32>
    %c13 = arith.constant 13 : index
    %54 = memref.load %arg1[%c13] : memref<76xf32, #tpu.memory_space<smem>>
    %55 = vector.broadcast %54 : f32 to vector<1x2xf32>
    %56 = arith.mulf %55, %1 : vector<1x2xf32>
    %c23 = arith.constant 23 : index
    %57 = memref.load %arg1[%c23] : memref<76xf32, #tpu.memory_space<smem>>
    %58 = vector.broadcast %57 : f32 to vector<1x2xf32>
    %59 = arith.mulf %58, %2 : vector<1x2xf32>
    %60 = arith.addf %53, %56 : vector<1x2xf32>
    %61 = arith.addf %60, %59 : vector<1x2xf32>
    %c33 = arith.constant 33 : index
    %62 = memref.load %arg1[%c33] : memref<76xf32, #tpu.memory_space<smem>>
    %63 = vector.broadcast %62 : f32 to vector<1x2xf32>
    %64 = arith.addf %61, %63 : vector<1x2xf32>
    %cst_8 = arith.constant 0.000000e+00 : f32
    %65 = vector.broadcast %cst_8 : f32 to vector<1x2xf32>
    %66 = arith.maximumf %64, %65 : vector<1x2xf32>
    %c4 = arith.constant 4 : index
    %67 = memref.load %arg1[%c4] : memref<76xf32, #tpu.memory_space<smem>>
    %68 = vector.broadcast %67 : f32 to vector<1x2xf32>
    %69 = arith.mulf %68, %0 : vector<1x2xf32>
    %c14 = arith.constant 14 : index
    %70 = memref.load %arg1[%c14] : memref<76xf32, #tpu.memory_space<smem>>
    %71 = vector.broadcast %70 : f32 to vector<1x2xf32>
    %72 = arith.mulf %71, %1 : vector<1x2xf32>
    %c24 = arith.constant 24 : index
    %73 = memref.load %arg1[%c24] : memref<76xf32, #tpu.memory_space<smem>>
    %74 = vector.broadcast %73 : f32 to vector<1x2xf32>
    %75 = arith.mulf %74, %2 : vector<1x2xf32>
    %76 = arith.addf %69, %72 : vector<1x2xf32>
    %77 = arith.addf %76, %75 : vector<1x2xf32>
    %c34 = arith.constant 34 : index
    %78 = memref.load %arg1[%c34] : memref<76xf32, #tpu.memory_space<smem>>
    %79 = vector.broadcast %78 : f32 to vector<1x2xf32>
    %80 = arith.addf %77, %79 : vector<1x2xf32>
    %cst_9 = arith.constant 0.000000e+00 : f32
    %81 = vector.broadcast %cst_9 : f32 to vector<1x2xf32>
    %82 = arith.maximumf %80, %81 : vector<1x2xf32>
    %c5 = arith.constant 5 : index
    %83 = memref.load %arg1[%c5] : memref<76xf32, #tpu.memory_space<smem>>
    %84 = vector.broadcast %83 : f32 to vector<1x2xf32>
    %85 = arith.mulf %84, %0 : vector<1x2xf32>
    %c15 = arith.constant 15 : index
    %86 = memref.load %arg1[%c15] : memref<76xf32, #tpu.memory_space<smem>>
    %87 = vector.broadcast %86 : f32 to vector<1x2xf32>
    %88 = arith.mulf %87, %1 : vector<1x2xf32>
    %c25 = arith.constant 25 : index
    %89 = memref.load %arg1[%c25] : memref<76xf32, #tpu.memory_space<smem>>
    %90 = vector.broadcast %89 : f32 to vector<1x2xf32>
    %91 = arith.mulf %90, %2 : vector<1x2xf32>
    %92 = arith.addf %85, %88 : vector<1x2xf32>
    %93 = arith.addf %92, %91 : vector<1x2xf32>
    %c35 = arith.constant 35 : index
    %94 = memref.load %arg1[%c35] : memref<76xf32, #tpu.memory_space<smem>>
    %95 = vector.broadcast %94 : f32 to vector<1x2xf32>
    %96 = arith.addf %93, %95 : vector<1x2xf32>
    %cst_10 = arith.constant 0.000000e+00 : f32
    %97 = vector.broadcast %cst_10 : f32 to vector<1x2xf32>
    %98 = arith.maximumf %96, %97 : vector<1x2xf32>
    %c6 = arith.constant 6 : index
    %99 = memref.load %arg1[%c6] : memref<76xf32, #tpu.memory_space<smem>>
    %100 = vector.broadcast %99 : f32 to vector<1x2xf32>
    %101 = arith.mulf %100, %0 : vector<1x2xf32>
    %c16 = arith.constant 16 : index
    %102 = memref.load %arg1[%c16] : memref<76xf32, #tpu.memory_space<smem>>
    %103 = vector.broadcast %102 : f32 to vector<1x2xf32>
    %104 = arith.mulf %103, %1 : vector<1x2xf32>
    %c26 = arith.constant 26 : index
    %105 = memref.load %arg1[%c26] : memref<76xf32, #tpu.memory_space<smem>>
    %106 = vector.broadcast %105 : f32 to vector<1x2xf32>
    %107 = arith.mulf %106, %2 : vector<1x2xf32>
    %108 = arith.addf %101, %104 : vector<1x2xf32>
    %109 = arith.addf %108, %107 : vector<1x2xf32>
    %c36 = arith.constant 36 : index
    %110 = memref.load %arg1[%c36] : memref<76xf32, #tpu.memory_space<smem>>
    %111 = vector.broadcast %110 : f32 to vector<1x2xf32>
    %112 = arith.addf %109, %111 : vector<1x2xf32>
    %cst_11 = arith.constant 0.000000e+00 : f32
    %113 = vector.broadcast %cst_11 : f32 to vector<1x2xf32>
    %114 = arith.maximumf %112, %113 : vector<1x2xf32>
    %c7 = arith.constant 7 : index
    %115 = memref.load %arg1[%c7] : memref<76xf32, #tpu.memory_space<smem>>
    %116 = vector.broadcast %115 : f32 to vector<1x2xf32>
    %117 = arith.mulf %116, %0 : vector<1x2xf32>
    %c17 = arith.constant 17 : index
    %118 = memref.load %arg1[%c17] : memref<76xf32, #tpu.memory_space<smem>>
    %119 = vector.broadcast %118 : f32 to vector<1x2xf32>
    %120 = arith.mulf %119, %1 : vector<1x2xf32>
    %c27 = arith.constant 27 : index
    %121 = memref.load %arg1[%c27] : memref<76xf32, #tpu.memory_space<smem>>
    %122 = vector.broadcast %121 : f32 to vector<1x2xf32>
    %123 = arith.mulf %122, %2 : vector<1x2xf32>
    %124 = arith.addf %117, %120 : vector<1x2xf32>
    %125 = arith.addf %124, %123 : vector<1x2xf32>
    %c37 = arith.constant 37 : index
    %126 = memref.load %arg1[%c37] : memref<76xf32, #tpu.memory_space<smem>>
    %127 = vector.broadcast %126 : f32 to vector<1x2xf32>
    %128 = arith.addf %125, %127 : vector<1x2xf32>
    %cst_12 = arith.constant 0.000000e+00 : f32
    %129 = vector.broadcast %cst_12 : f32 to vector<1x2xf32>
    %130 = arith.maximumf %128, %129 : vector<1x2xf32>
    %c8 = arith.constant 8 : index
    %131 = memref.load %arg1[%c8] : memref<76xf32, #tpu.memory_space<smem>>
    %132 = vector.broadcast %131 : f32 to vector<1x2xf32>
    %133 = arith.mulf %132, %0 : vector<1x2xf32>
    %c18 = arith.constant 18 : index
    %134 = memref.load %arg1[%c18] : memref<76xf32, #tpu.memory_space<smem>>
    %135 = vector.broadcast %134 : f32 to vector<1x2xf32>
    %136 = arith.mulf %135, %1 : vector<1x2xf32>
    %c28 = arith.constant 28 : index
    %137 = memref.load %arg1[%c28] : memref<76xf32, #tpu.memory_space<smem>>
    %138 = vector.broadcast %137 : f32 to vector<1x2xf32>
    %139 = arith.mulf %138, %2 : vector<1x2xf32>
    %140 = arith.addf %133, %136 : vector<1x2xf32>
    %141 = arith.addf %140, %139 : vector<1x2xf32>
    %c38 = arith.constant 38 : index
    %142 = memref.load %arg1[%c38] : memref<76xf32, #tpu.memory_space<smem>>
    %143 = vector.broadcast %142 : f32 to vector<1x2xf32>
    %144 = arith.addf %141, %143 : vector<1x2xf32>
    %cst_13 = arith.constant 0.000000e+00 : f32
    %145 = vector.broadcast %cst_13 : f32 to vector<1x2xf32>
    %146 = arith.maximumf %144, %145 : vector<1x2xf32>
    %c9 = arith.constant 9 : index
    %147 = memref.load %arg1[%c9] : memref<76xf32, #tpu.memory_space<smem>>
    %148 = vector.broadcast %147 : f32 to vector<1x2xf32>
    %149 = arith.mulf %148, %0 : vector<1x2xf32>
    %c19 = arith.constant 19 : index
    %150 = memref.load %arg1[%c19] : memref<76xf32, #tpu.memory_space<smem>>
    %151 = vector.broadcast %150 : f32 to vector<1x2xf32>
    %152 = arith.mulf %151, %1 : vector<1x2xf32>
    %c29 = arith.constant 29 : index
    %153 = memref.load %arg1[%c29] : memref<76xf32, #tpu.memory_space<smem>>
    %154 = vector.broadcast %153 : f32 to vector<1x2xf32>
    %155 = arith.mulf %154, %2 : vector<1x2xf32>
    %156 = arith.addf %149, %152 : vector<1x2xf32>
    %157 = arith.addf %156, %155 : vector<1x2xf32>
    %c39 = arith.constant 39 : index
    %158 = memref.load %arg1[%c39] : memref<76xf32, #tpu.memory_space<smem>>
    %159 = vector.broadcast %158 : f32 to vector<1x2xf32>
    %160 = arith.addf %157, %159 : vector<1x2xf32>
    %cst_14 = arith.constant 0.000000e+00 : f32
    %161 = vector.broadcast %cst_14 : f32 to vector<1x2xf32>
    %162 = arith.maximumf %160, %161 : vector<1x2xf32>
    %c40 = arith.constant 40 : index
    %163 = memref.load %arg1[%c40] : memref<76xf32, #tpu.memory_space<smem>>
    %164 = vector.broadcast %163 : f32 to vector<1x2xf32>
    %165 = arith.mulf %164, %18 : vector<1x2xf32>
    %c43 = arith.constant 43 : index
    %166 = memref.load %arg1[%c43] : memref<76xf32, #tpu.memory_space<smem>>
    %167 = vector.broadcast %166 : f32 to vector<1x2xf32>
    %168 = arith.mulf %167, %34 : vector<1x2xf32>
    %c46 = arith.constant 46 : index
    %169 = memref.load %arg1[%c46] : memref<76xf32, #tpu.memory_space<smem>>
    %170 = vector.broadcast %169 : f32 to vector<1x2xf32>
    %171 = arith.mulf %170, %50 : vector<1x2xf32>
    %c49 = arith.constant 49 : index
    %172 = memref.load %arg1[%c49] : memref<76xf32, #tpu.memory_space<smem>>
    %173 = vector.broadcast %172 : f32 to vector<1x2xf32>
    %174 = arith.mulf %173, %66 : vector<1x2xf32>
    %c52 = arith.constant 52 : index
    %175 = memref.load %arg1[%c52] : memref<76xf32, #tpu.memory_space<smem>>
    %176 = vector.broadcast %175 : f32 to vector<1x2xf32>
    %177 = arith.mulf %176, %82 : vector<1x2xf32>
    %c55 = arith.constant 55 : index
    %178 = memref.load %arg1[%c55] : memref<76xf32, #tpu.memory_space<smem>>
    %179 = vector.broadcast %178 : f32 to vector<1x2xf32>
    %180 = arith.mulf %179, %98 : vector<1x2xf32>
    %c58 = arith.constant 58 : index
    %181 = memref.load %arg1[%c58] : memref<76xf32, #tpu.memory_space<smem>>
    %182 = vector.broadcast %181 : f32 to vector<1x2xf32>
    %183 = arith.mulf %182, %114 : vector<1x2xf32>
    %c61 = arith.constant 61 : index
    %184 = memref.load %arg1[%c61] : memref<76xf32, #tpu.memory_space<smem>>
    %185 = vector.broadcast %184 : f32 to vector<1x2xf32>
    %186 = arith.mulf %185, %130 : vector<1x2xf32>
    %c64 = arith.constant 64 : index
    %187 = memref.load %arg1[%c64] : memref<76xf32, #tpu.memory_space<smem>>
    %188 = vector.broadcast %187 : f32 to vector<1x2xf32>
    %189 = arith.mulf %188, %146 : vector<1x2xf32>
    %c67 = arith.constant 67 : index
    %190 = memref.load %arg1[%c67] : memref<76xf32, #tpu.memory_space<smem>>
    %191 = vector.broadcast %190 : f32 to vector<1x2xf32>
    %192 = arith.mulf %191, %162 : vector<1x2xf32>
    %193 = arith.addf %165, %168 : vector<1x2xf32>
    %194 = arith.addf %171, %174 : vector<1x2xf32>
    %195 = arith.addf %177, %180 : vector<1x2xf32>
    %196 = arith.addf %183, %186 : vector<1x2xf32>
    %197 = arith.addf %189, %192 : vector<1x2xf32>
    %198 = arith.addf %193, %194 : vector<1x2xf32>
    %199 = arith.addf %195, %196 : vector<1x2xf32>
    %200 = arith.addf %198, %199 : vector<1x2xf32>
    %201 = arith.addf %200, %197 : vector<1x2xf32>
    %c70 = arith.constant 70 : index
    %202 = memref.load %arg1[%c70] : memref<76xf32, #tpu.memory_space<smem>>
    %203 = vector.broadcast %202 : f32 to vector<1x2xf32>
    %204 = arith.addf %201, %203 : vector<1x2xf32>
    %c41 = arith.constant 41 : index
    %205 = memref.load %arg1[%c41] : memref<76xf32, #tpu.memory_space<smem>>
    %206 = vector.broadcast %205 : f32 to vector<1x2xf32>
    %207 = arith.mulf %206, %18 : vector<1x2xf32>
    %c44 = arith.constant 44 : index
    %208 = memref.load %arg1[%c44] : memref<76xf32, #tpu.memory_space<smem>>
    %209 = vector.broadcast %208 : f32 to vector<1x2xf32>
    %210 = arith.mulf %209, %34 : vector<1x2xf32>
    %c47 = arith.constant 47 : index
    %211 = memref.load %arg1[%c47] : memref<76xf32, #tpu.memory_space<smem>>
    %212 = vector.broadcast %211 : f32 to vector<1x2xf32>
    %213 = arith.mulf %212, %50 : vector<1x2xf32>
    %c50 = arith.constant 50 : index
    %214 = memref.load %arg1[%c50] : memref<76xf32, #tpu.memory_space<smem>>
    %215 = vector.broadcast %214 : f32 to vector<1x2xf32>
    %216 = arith.mulf %215, %66 : vector<1x2xf32>
    %c53 = arith.constant 53 : index
    %217 = memref.load %arg1[%c53] : memref<76xf32, #tpu.memory_space<smem>>
    %218 = vector.broadcast %217 : f32 to vector<1x2xf32>
    %219 = arith.mulf %218, %82 : vector<1x2xf32>
    %c56 = arith.constant 56 : index
    %220 = memref.load %arg1[%c56] : memref<76xf32, #tpu.memory_space<smem>>
    %221 = vector.broadcast %220 : f32 to vector<1x2xf32>
    %222 = arith.mulf %221, %98 : vector<1x2xf32>
    %c59 = arith.constant 59 : index
    %223 = memref.load %arg1[%c59] : memref<76xf32, #tpu.memory_space<smem>>
    %224 = vector.broadcast %223 : f32 to vector<1x2xf32>
    %225 = arith.mulf %224, %114 : vector<1x2xf32>
    %c62 = arith.constant 62 : index
    %226 = memref.load %arg1[%c62] : memref<76xf32, #tpu.memory_space<smem>>
    %227 = vector.broadcast %226 : f32 to vector<1x2xf32>
    %228 = arith.mulf %227, %130 : vector<1x2xf32>
    %c65 = arith.constant 65 : index
    %229 = memref.load %arg1[%c65] : memref<76xf32, #tpu.memory_space<smem>>
    %230 = vector.broadcast %229 : f32 to vector<1x2xf32>
    %231 = arith.mulf %230, %146 : vector<1x2xf32>
    %c68 = arith.constant 68 : index
    %232 = memref.load %arg1[%c68] : memref<76xf32, #tpu.memory_space<smem>>
    %233 = vector.broadcast %232 : f32 to vector<1x2xf32>
    %234 = arith.mulf %233, %162 : vector<1x2xf32>
    %235 = arith.addf %207, %210 : vector<1x2xf32>
    %236 = arith.addf %213, %216 : vector<1x2xf32>
    %237 = arith.addf %219, %222 : vector<1x2xf32>
    %238 = arith.addf %225, %228 : vector<1x2xf32>
    %239 = arith.addf %231, %234 : vector<1x2xf32>
    %240 = arith.addf %235, %236 : vector<1x2xf32>
    %241 = arith.addf %237, %238 : vector<1x2xf32>
    %242 = arith.addf %240, %241 : vector<1x2xf32>
    %243 = arith.addf %242, %239 : vector<1x2xf32>
    %c71 = arith.constant 71 : index
    %244 = memref.load %arg1[%c71] : memref<76xf32, #tpu.memory_space<smem>>
    %245 = vector.broadcast %244 : f32 to vector<1x2xf32>
    %246 = arith.addf %243, %245 : vector<1x2xf32>
    %c42 = arith.constant 42 : index
    %247 = memref.load %arg1[%c42] : memref<76xf32, #tpu.memory_space<smem>>
    %248 = vector.broadcast %247 : f32 to vector<1x2xf32>
    %249 = arith.mulf %248, %18 : vector<1x2xf32>
    %c45 = arith.constant 45 : index
    %250 = memref.load %arg1[%c45] : memref<76xf32, #tpu.memory_space<smem>>
    %251 = vector.broadcast %250 : f32 to vector<1x2xf32>
    %252 = arith.mulf %251, %34 : vector<1x2xf32>
    %c48 = arith.constant 48 : index
    %253 = memref.load %arg1[%c48] : memref<76xf32, #tpu.memory_space<smem>>
    %254 = vector.broadcast %253 : f32 to vector<1x2xf32>
    %255 = arith.mulf %254, %50 : vector<1x2xf32>
    %c51 = arith.constant 51 : index
    %256 = memref.load %arg1[%c51] : memref<76xf32, #tpu.memory_space<smem>>
    %257 = vector.broadcast %256 : f32 to vector<1x2xf32>
    %258 = arith.mulf %257, %66 : vector<1x2xf32>
    %c54 = arith.constant 54 : index
    %259 = memref.load %arg1[%c54] : memref<76xf32, #tpu.memory_space<smem>>
    %260 = vector.broadcast %259 : f32 to vector<1x2xf32>
    %261 = arith.mulf %260, %82 : vector<1x2xf32>
    %c57 = arith.constant 57 : index
    %262 = memref.load %arg1[%c57] : memref<76xf32, #tpu.memory_space<smem>>
    %263 = vector.broadcast %262 : f32 to vector<1x2xf32>
    %264 = arith.mulf %263, %98 : vector<1x2xf32>
    %c60 = arith.constant 60 : index
    %265 = memref.load %arg1[%c60] : memref<76xf32, #tpu.memory_space<smem>>
    %266 = vector.broadcast %265 : f32 to vector<1x2xf32>
    %267 = arith.mulf %266, %114 : vector<1x2xf32>
    %c63 = arith.constant 63 : index
    %268 = memref.load %arg1[%c63] : memref<76xf32, #tpu.memory_space<smem>>
    %269 = vector.broadcast %268 : f32 to vector<1x2xf32>
    %270 = arith.mulf %269, %130 : vector<1x2xf32>
    %c66 = arith.constant 66 : index
    %271 = memref.load %arg1[%c66] : memref<76xf32, #tpu.memory_space<smem>>
    %272 = vector.broadcast %271 : f32 to vector<1x2xf32>
    %273 = arith.mulf %272, %146 : vector<1x2xf32>
    %c69 = arith.constant 69 : index
    %274 = memref.load %arg1[%c69] : memref<76xf32, #tpu.memory_space<smem>>
    %275 = vector.broadcast %274 : f32 to vector<1x2xf32>
    %276 = arith.mulf %275, %162 : vector<1x2xf32>
    %277 = arith.addf %249, %252 : vector<1x2xf32>
    %278 = arith.addf %255, %258 : vector<1x2xf32>
    %279 = arith.addf %261, %264 : vector<1x2xf32>
    %280 = arith.addf %267, %270 : vector<1x2xf32>
    %281 = arith.addf %273, %276 : vector<1x2xf32>
    %282 = arith.addf %277, %278 : vector<1x2xf32>
    %283 = arith.addf %279, %280 : vector<1x2xf32>
    %284 = arith.addf %282, %283 : vector<1x2xf32>
    %285 = arith.addf %284, %281 : vector<1x2xf32>
    %c72 = arith.constant 72 : index
    %286 = memref.load %arg1[%c72] : memref<76xf32, #tpu.memory_space<smem>>
    %287 = vector.broadcast %286 : f32 to vector<1x2xf32>
    %288 = arith.addf %285, %287 : vector<1x2xf32>
    %c73 = arith.constant 73 : index
    %289 = memref.load %arg1[%c73] : memref<76xf32, #tpu.memory_space<smem>>
    %c74 = arith.constant 74 : index
    %290 = memref.load %arg1[%c74] : memref<76xf32, #tpu.memory_space<smem>>
    %c75 = arith.constant 75 : index
    %291 = memref.load %arg1[%c75] : memref<76xf32, #tpu.memory_space<smem>>
    %292 = vector.extract_strided_slice %204 {offsets = [0, 0], sizes = [1, 1], strides = [1, 1]} : vector<1x2xf32> to vector<1x1xf32>
    %293 = vector.extract_strided_slice %246 {offsets = [0, 0], sizes = [1, 1], strides = [1, 1]} : vector<1x2xf32> to vector<1x1xf32>
    %294 = vector.extract_strided_slice %288 {offsets = [0, 0], sizes = [1, 1], strides = [1, 1]} : vector<1x2xf32> to vector<1x1xf32>
    %295 = arith.subf %293, %292 : vector<1x1xf32>
    %296 = vector.broadcast %289 : f32 to vector<1x1xf32>
    %297 = arith.mulf %296, %295 : vector<1x1xf32>
    %298 = vector.broadcast %290 : f32 to vector<1x1xf32>
    %299 = arith.mulf %298, %292 : vector<1x1xf32>
    %300 = arith.subf %299, %293 : vector<1x1xf32>
    %301 = arith.mulf %292, %294 : vector<1x1xf32>
    %302 = arith.subf %300, %301 : vector<1x1xf32>
    %303 = arith.mulf %292, %293 : vector<1x1xf32>
    %304 = vector.broadcast %291 : f32 to vector<1x1xf32>
    %305 = arith.mulf %304, %294 : vector<1x1xf32>
    %306 = arith.subf %303, %305 : vector<1x1xf32>
    %cst_15 = arith.constant 1.000000e-01 : f32
    %307 = vector.broadcast %cst_15 : f32 to vector<1x1xf32>
    %308 = arith.mulf %307, %297 : vector<1x1xf32>
    %cst_16 = arith.constant 2.000000e+00 : f32
    %309 = vector.broadcast %cst_16 : f32 to vector<1x1xf32>
    %310 = arith.divf %308, %309 : vector<1x1xf32>
    %311 = arith.addf %292, %310 : vector<1x1xf32>
    %cst_17 = arith.constant 1.000000e-01 : f32
    %312 = vector.broadcast %cst_17 : f32 to vector<1x1xf32>
    %313 = arith.mulf %312, %302 : vector<1x1xf32>
    %cst_18 = arith.constant 2.000000e+00 : f32
    %314 = vector.broadcast %cst_18 : f32 to vector<1x1xf32>
    %315 = arith.divf %313, %314 : vector<1x1xf32>
    %316 = arith.addf %293, %315 : vector<1x1xf32>
    %cst_19 = arith.constant 1.000000e-01 : f32
    %317 = vector.broadcast %cst_19 : f32 to vector<1x1xf32>
    %318 = arith.mulf %317, %306 : vector<1x1xf32>
    %cst_20 = arith.constant 2.000000e+00 : f32
    %319 = vector.broadcast %cst_20 : f32 to vector<1x1xf32>
    %320 = arith.divf %318, %319 : vector<1x1xf32>
    %321 = arith.addf %294, %320 : vector<1x1xf32>
    %322 = arith.subf %316, %311 : vector<1x1xf32>
    %323 = vector.broadcast %289 : f32 to vector<1x1xf32>
    %324 = arith.mulf %323, %322 : vector<1x1xf32>
    %325 = vector.broadcast %290 : f32 to vector<1x1xf32>
    %326 = arith.mulf %325, %311 : vector<1x1xf32>
    %327 = arith.subf %326, %316 : vector<1x1xf32>
    %328 = arith.mulf %311, %321 : vector<1x1xf32>
    %329 = arith.subf %327, %328 : vector<1x1xf32>
    %330 = arith.mulf %311, %316 : vector<1x1xf32>
    %331 = vector.broadcast %291 : f32 to vector<1x1xf32>
    %332 = arith.mulf %331, %321 : vector<1x1xf32>
    %333 = arith.subf %330, %332 : vector<1x1xf32>
    %cst_21 = arith.constant 1.000000e-01 : f32
    %334 = vector.broadcast %cst_21 : f32 to vector<1x1xf32>
    %335 = arith.mulf %334, %324 : vector<1x1xf32>
    %cst_22 = arith.constant 2.000000e+00 : f32
    %336 = vector.broadcast %cst_22 : f32 to vector<1x1xf32>
    %337 = arith.divf %335, %336 : vector<1x1xf32>
    %338 = arith.addf %292, %337 : vector<1x1xf32>
    %cst_23 = arith.constant 1.000000e-01 : f32
    %339 = vector.broadcast %cst_23 : f32 to vector<1x1xf32>
    %340 = arith.mulf %339, %329 : vector<1x1xf32>
    %cst_24 = arith.constant 2.000000e+00 : f32
    %341 = vector.broadcast %cst_24 : f32 to vector<1x1xf32>
    %342 = arith.divf %340, %341 : vector<1x1xf32>
    %343 = arith.addf %293, %342 : vector<1x1xf32>
    %cst_25 = arith.constant 1.000000e-01 : f32
    %344 = vector.broadcast %cst_25 : f32 to vector<1x1xf32>
    %345 = arith.mulf %344, %333 : vector<1x1xf32>
    %cst_26 = arith.constant 2.000000e+00 : f32
    %346 = vector.broadcast %cst_26 : f32 to vector<1x1xf32>
    %347 = arith.divf %345, %346 : vector<1x1xf32>
    %348 = arith.addf %294, %347 : vector<1x1xf32>
    %349 = arith.subf %343, %338 : vector<1x1xf32>
    %350 = vector.broadcast %289 : f32 to vector<1x1xf32>
    %351 = arith.mulf %350, %349 : vector<1x1xf32>
    %352 = vector.broadcast %290 : f32 to vector<1x1xf32>
    %353 = arith.mulf %352, %338 : vector<1x1xf32>
    %354 = arith.subf %353, %343 : vector<1x1xf32>
    %355 = arith.mulf %338, %348 : vector<1x1xf32>
    %356 = arith.subf %354, %355 : vector<1x1xf32>
    %357 = arith.mulf %338, %343 : vector<1x1xf32>
    %358 = vector.broadcast %291 : f32 to vector<1x1xf32>
    %359 = arith.mulf %358, %348 : vector<1x1xf32>
    %360 = arith.subf %357, %359 : vector<1x1xf32>
    %cst_27 = arith.constant 1.000000e-01 : f32
    %361 = vector.broadcast %cst_27 : f32 to vector<1x1xf32>
    %362 = arith.mulf %361, %351 : vector<1x1xf32>
    %363 = arith.addf %292, %362 : vector<1x1xf32>
    %cst_28 = arith.constant 1.000000e-01 : f32
    %364 = vector.broadcast %cst_28 : f32 to vector<1x1xf32>
    %365 = arith.mulf %364, %356 : vector<1x1xf32>
    %366 = arith.addf %293, %365 : vector<1x1xf32>
    %cst_29 = arith.constant 1.000000e-01 : f32
    %367 = vector.broadcast %cst_29 : f32 to vector<1x1xf32>
    %368 = arith.mulf %367, %360 : vector<1x1xf32>
    %369 = arith.addf %294, %368 : vector<1x1xf32>
    %370 = arith.subf %366, %363 : vector<1x1xf32>
    %371 = vector.broadcast %289 : f32 to vector<1x1xf32>
    %372 = arith.mulf %371, %370 : vector<1x1xf32>
    %373 = vector.broadcast %290 : f32 to vector<1x1xf32>
    %374 = arith.mulf %373, %363 : vector<1x1xf32>
    %375 = arith.subf %374, %366 : vector<1x1xf32>
    %376 = arith.mulf %363, %369 : vector<1x1xf32>
    %377 = arith.subf %375, %376 : vector<1x1xf32>
    %378 = arith.mulf %363, %366 : vector<1x1xf32>
    %379 = vector.broadcast %291 : f32 to vector<1x1xf32>
    %380 = arith.mulf %379, %369 : vector<1x1xf32>
    %381 = arith.subf %378, %380 : vector<1x1xf32>
    %cst_30 = arith.constant 2.000000e+00 : f32
    %382 = vector.broadcast %cst_30 : f32 to vector<1x1xf32>
    %383 = arith.mulf %382, %324 : vector<1x1xf32>
    %384 = arith.addf %297, %383 : vector<1x1xf32>
    %cst_31 = arith.constant 2.000000e+00 : f32
    %385 = vector.broadcast %cst_31 : f32 to vector<1x1xf32>
    %386 = arith.mulf %385, %351 : vector<1x1xf32>
    %387 = arith.addf %384, %386 : vector<1x1xf32>
    %388 = arith.addf %387, %372 : vector<1x1xf32>
    %cst_32 = arith.constant 1.000000e-01 : f32
    %389 = vector.broadcast %cst_32 : f32 to vector<1x1xf32>
    %390 = arith.mulf %389, %388 : vector<1x1xf32>
    %cst_33 = arith.constant 6.000000e+00 : f32
    %391 = vector.broadcast %cst_33 : f32 to vector<1x1xf32>
    %392 = arith.divf %390, %391 : vector<1x1xf32>
    %393 = vector.broadcast %392 : vector<1x1xf32> to vector<1x2xf32>
    %394 = arith.addf %204, %393 : vector<1x2xf32>
    %c0_34 = arith.constant 0 : index
    %c0_35 = arith.constant 0 : index
    %395 = vector.load %arg2[%c0_34, %c0_35] : memref<3x2xf32, #tpu.memory_space<vmem>>, vector<1x2xf32>
    tpu.vector_store %arg2[%c0_34, %c0_35], %394 {strides = array<i32>} : memref<3x2xf32, #tpu.memory_space<vmem>>, vector<1x2xf32>,
    %cst_36 = arith.constant 2.000000e+00 : f32
    %396 = vector.broadcast %cst_36 : f32 to vector<1x1xf32>
    %397 = arith.mulf %396, %329 : vector<1x1xf32>
    %398 = arith.addf %302, %397 : vector<1x1xf32>
    %cst_37 = arith.constant 2.000000e+00 : f32
    %399 = vector.broadcast %cst_37 : f32 to vector<1x1xf32>
    %400 = arith.mulf %399, %356 : vector<1x1xf32>
    %401 = arith.addf %398, %400 : vector<1x1xf32>
    %402 = arith.addf %401, %377 : vector<1x1xf32>
    %cst_38 = arith.constant 1.000000e-01 : f32
    %403 = vector.broadcast %cst_38 : f32 to vector<1x1xf32>
    %404 = arith.mulf %403, %402 : vector<1x1xf32>
    %cst_39 = arith.constant 6.000000e+00 : f32
    %405 = vector.broadcast %cst_39 : f32 to vector<1x1xf32>
    %406 = arith.divf %404, %405 : vector<1x1xf32>
    %407 = vector.broadcast %406 : vector<1x1xf32> to vector<1x2xf32>
    %408 = arith.addf %246, %407 : vector<1x2xf32>
    %c1_40 = arith.constant 1 : index
    %c0_41 = arith.constant 0 : index
    %409 = vector.load %arg2[%c1_40, %c0_41] : memref<3x2xf32, #tpu.memory_space<vmem>>, vector<1x2xf32>
    tpu.vector_store %arg2[%c1_40, %c0_41], %408 {strides = array<i32>} : memref<3x2xf32, #tpu.memory_space<vmem>>, vector<1x2xf32>,
    %cst_42 = arith.constant 2.000000e+00 : f32
    %410 = vector.broadcast %cst_42 : f32 to vector<1x1xf32>
    %411 = arith.mulf %410, %333 : vector<1x1xf32>
    %412 = arith.addf %306, %411 : vector<1x1xf32>
    %cst_43 = arith.constant 2.000000e+00 : f32
    %413 = vector.broadcast %cst_43 : f32 to vector<1x1xf32>
    %414 = arith.mulf %413, %360 : vector<1x1xf32>
    %415 = arith.addf %412, %414 : vector<1x1xf32>
    %416 = arith.addf %415, %381 : vector<1x1xf32>
    %cst_44 = arith.constant 1.000000e-01 : f32
    %417 = vector.broadcast %cst_44 : f32 to vector<1x1xf32>
    %418 = arith.mulf %417, %416 : vector<1x1xf32>
    %cst_45 = arith.constant 6.000000e+00 : f32
    %419 = vector.broadcast %cst_45 : f32 to vector<1x1xf32>
    %420 = arith.divf %418, %419 : vector<1x1xf32>
    %421 = vector.broadcast %420 : vector<1x1xf32> to vector<1x2xf32>
    %422 = arith.addf %288, %421 : vector<1x2xf32>
    %c2_46 = arith.constant 2 : index
    %c0_47 = arith.constant 0 : index
    %423 = vector.load %arg2[%c2_46, %c0_47] : memref<3x2xf32, #tpu.memory_space<vmem>>, vector<1x2xf32>
    tpu.vector_store %arg2[%c2_46, %c0_47], %422 {strides = array<i32>} : memref<3x2xf32, #tpu.memory_space<vmem>>, vector<1x2xf32>,
    return
  }
}

</mosaic_0001>

<bundles_post_ra>
// kernel: net_forward.1
= control target key start
LH: loop header
LB: loop body
LE: loop exit
PB: predicated region body
PF: predicated region fallthrough
CT: control target
= control target key end

     0   :  { %7 = vsyncpa [#allocation3], 0  ;;  %s879_s0 = inlined_call_operand.vmem [shape: f32[3,2], index: 0, kind: input, shape index: {}]   ;;  %s880_s1 = inlined_call_operand.vmem [shape: f32[76], index: 1, kind: input, shape index: {}]   ;;  %s881_s2 = inlined_call_operand.vmem [shape: f32[3,2], index: 2, kind: output, shape index: {}]  }
   0x1   :  { %s16_s11 = sshll.u32 %s880_s1, 4  ;;  %s17_s11 = int_to_ptr.vmem [resolvable:$true] %s16_s11 }
   0x2   :  { %s498_s12 = scalar_lea.vmem %s17_s11, 16  ;;  %p503_p1 = scmp.lt.s32.totalorder %s17_s11, %s17_s11 }
   0x3   :  { %p499_p0 = scmp.ne.s32.totalorder %s17_s11, %s498_s12  ;;  %p504_p2 = scmp.lt.s32.totalorder %s498_s12, %s498_s12 }
   0x5   :  { %p505_p3 = por %p504_p2, %p503_p1 }
   0x7   :  { %p506_p4 = pnand %p505_p3, %p499_p0 }
   0x9   :  { %509 = shalt.err (!%p506_p4)
}
   0xa   :  { %s512_s13 = smov [#allocation2]  }
   0xb   :  { %19 = dma.vmem_to_smem %s17_s11, 16, %s512_s13, [#allocation3]  }
   0xc   :  { %510 = dma.done.wait [#allocation3], 16  }
   0xd   :  { %511 = vsyncadd [#allocation3], 4294967280 }
   0xe   :  { %23 = sfence }
   0xf   :  { %v513_v0 = vmov 0   ;;  %s27_s14 = sld [smem:[#allocation2]]  ;;  %s419_s15 = sld [smem:[#allocation2 + $0xa]]  ;;  %v537_v1 = vld [vmem:[%s879_s0] sm:$0x1]  ;;  %vm384_vm0 = vcmask 8192  }
  0x10   :  { %496 = vset.pattern.permute.xlu0 %v513_v0  ;;  %497 = vset.pattern.permute.xlu1 %v513_v0  ;;  %s420_s16 = sld [smem:[#allocation2 + $0x14]]  ;;  %s532_s1 = sld [smem:[#allocation2 + $0x1e]]  ;;  %v544_v2 = vld [vmem:[%s879_s0 + $0x1] sm:$0x1]  ;;  %v553_v3 = vld [vmem:[%s879_s0 + $0x2] sm:$0x1] }
  0x11   :  { %s422_s17 = sld [smem:[#allocation2 + $0x1]]  ;;  %s423_s18 = sld [smem:[#allocation2 + $0xb]] }
  0x12   :  { %s424_s21 = sld [smem:[#allocation2 + $0x15]]  ;;  %s539_s22 = sld [smem:[#allocation2 + $0x1f]] }
  0x13   :  { %s546_s25 = sld [smem:[#allocation2 + $0x2]]  ;;  %s548_s26 = sld [smem:[#allocation2 + $0xc]] }
  0x14   :  { %s555_s29 = sld [smem:[#allocation2 + $0x16]]  ;;  %s557_s30 = sld [smem:[#allocation2 + $0x20]] }
  0x15   :  { %v28_v4 = vstv %s27_s14  ;;  %v31_v5 = vstv %s419_s15  ;;  %s559_s3 = sld [smem:[#allocation2 + $0x3]]  ;;  %s561_s4 = sld [smem:[#allocation2 + $0xd]] }
  0x16   :  { %v29_v6 = vmul.f32 %v28_v4, %v537_v1  ;;  %v32_v7 = vmul.f32 %v31_v5, %v544_v2  ;;  %v34_v8 = vstv %s420_s16  ;;  %s565_s5 = sld [smem:[#allocation2 + $0x17]]  ;;  %s567_s0 = sld [smem:[#allocation2 + $0x21]]  ;;  %v39_v10 = vstv %s532_s1 }
  0x17   :  { %v35_v9 = vmul.f32 %v34_v8, %v553_v3  ;;  %v43_v11 = vstv %s422_s17  ;;  %v46_v12 = vstv %s423_s18  ;;  %s571_s6 = sld [smem:[#allocation2 + $0x4]]  ;;  %s573_s7 = sld [smem:[#allocation2 + $0xe]] }
  0x18   :  { %v36_v13 = vadd.f32 %v32_v7, %v29_v6  ;;  %v44_v14 = vmul.f32 %v43_v11, %v537_v1  ;;  %v47_v15 = vmul.f32 %v46_v12, %v544_v2  ;;  %v49_v16 = vstv %s424_s21  ;;  %s577_s8 = sld [smem:[#allocation2 + $0x18]]  ;;  %s583_s9 = sld [smem:[#allocation2 + $0x22]] }
  0x19   :  { %v50_v17 = vmul.f32 %v49_v16, %v553_v3  ;;  %v54_v18 = vstv %s539_s22  ;;  %v58_v19 = vstv %s546_s25  ;;  %v61_v20 = vstv %s548_s26  ;;  %s585_s10 = sld [smem:[#allocation2 + $0x5]]  ;;  %s589_s11 = sld [smem:[#allocation2 + $0xf]] }
  0x1a   :  { %v37_v21 = vadd.f32 %v36_v13, %v35_v9  ;;  %v51_v22 = vadd.f32 %v47_v15, %v44_v14  ;;  %v59_v23 = vmul.f32 %v58_v19, %v537_v1  ;;  %v62_v24 = vmul.f32 %v61_v20, %v544_v2  ;;  %s595_s12 = sld [smem:[#allocation2 + $0x19]]  ;;  %s597_s13 = sld [smem:[#allocation2 + $0x23]] }
  0x1b   :  { %v64_v25 = vstv %s555_s29  ;;  %v69_v26 = vstv %s557_s30  ;;  %v73_v27 = vstv %s559_s3  ;;  %v76_v28 = vstv %s561_s4  ;;  %s600_s14 = sld [smem:[#allocation2 + $0x6]]  ;;  %s602_s15 = sld [smem:[#allocation2 + $0x10]] }
  0x1c   :  { %v40_v29 = vadd.f32 %v39_v10, %v37_v21  ;;  %v52_v30 = vadd.f32 %v51_v22, %v50_v17  ;;  %v65_v31 = vmul.f32 %v64_v25, %v553_v3  ;;  %v66_v32 = vadd.f32 %v62_v24, %v59_v23  ;;  %s608_s16 = sld [smem:[#allocation2 + $0x1a]]  ;;  %s613_s1 = sld [smem:[#allocation2 + $0x24]] }
  0x1d   :  { %v74_v33 = vmul.f32 %v73_v27, %v537_v1  ;;  %v77_v34 = vmul.f32 %v76_v28, %v544_v2  ;;  %v79_v35 = vstv %s565_s5  ;;  %v84_v36 = vstv %s567_s0  ;;  %s615_s17 = sld [smem:[#allocation2 + $0x7]]  ;;  %s620_s18 = sld [smem:[#allocation2 + $0x11]] }
  0x1e   :  { %v610_v37 = vmax.f32 %v40_v29, 0.0  ;;  %v55_v38 = vadd.f32 %v54_v18, %v52_v30  ;;  %v67_v39 = vadd.f32 %v66_v32, %v65_v31  ;;  %v80_v40 = vmul.f32 %v79_v35, %v553_v3  ;;  %s626_s19 = sld [smem:[#allocation2 + $0x1b]]  ;;  %s628_s20 = sld [smem:[#allocation2 + $0x25]] }
  0x1f   :  { %v81_v41 = vadd.f32 %v77_v34, %v74_v33  ;;  %v88_v42 = vstv %s571_s6  ;;  %v91_v43 = vstv %s573_s7  ;;  %v94_v44 = vstv %s577_s8  ;;  %s633_s21 = sld [smem:[#allocation2 + $0x8]]  ;;  %s635_s22 = sld [smem:[#allocation2 + $0x12]] }
  0x20   :  { %v622_v45 = vmax.f32 %v55_v38, 0.0  ;;  %v70_v46 = vadd.f32 %v69_v26, %v67_v39  ;;  %v89_v47 = vmul.f32 %v88_v42, %v537_v1  ;;  %v92_v48 = vmul.f32 %v91_v43, %v544_v2  ;;  %s641_s23 = sld [smem:[#allocation2 + $0x1c]]  ;;  %s643_s24 = sld [smem:[#allocation2 + $0x26]] }
  0x21   :  { %v82_v49 = vadd.f32 %v81_v41, %v80_v40  ;;  %v95_v50 = vmul.f32 %v94_v44, %v553_v3  ;;  %v99_v51 = vstv %s583_s9  ;;  %v103_v52 = vstv %s585_s10  ;;  %s651_s25 = sld [smem:[#allocation2 + $0x9]]  ;;  %s653_s26 = sld [smem:[#allocation2 + $0x13]] }
  0x22   :  { %v637_v53 = vmax.f32 %v70_v46, 0.0  ;;  %v96_v54 = vadd.f32 %v92_v48, %v89_v47  ;;  %v104_v55 = vmul.f32 %v103_v52, %v537_v1  ;;  %v106_v56 = vstv %s589_s11  ;;  %s659_s27 = sld [smem:[#allocation2 + $0x1d]]  ;;  %s664_s28 = sld [smem:[#allocation2 + $0x27]] }
  0x23   :  { %v85_v57 = vadd.f32 %v84_v36, %v82_v49  ;;  %v107_v58 = vmul.f32 %v106_v56, %v544_v2  ;;  %v109_v59 = vstv %s595_s12  ;;  %v114_v60 = vstv %s597_s13  ;;  %s666_s29 = sld [smem:[#allocation2 + $0x28]]  ;;  %s670_s30 = sld [smem:[#allocation2 + $0x2b]] }
  0x24   :  { %v97_v61 = vadd.f32 %v96_v54, %v95_v50  ;;  %v110_v62 = vmul.f32 %v109_v59, %v553_v3  ;;  %v118_v63 = vstv %s600_s14  ;;  %v121_v0 = vstv %s602_s15  ;;  %s677_s3 = sld [smem:[#allocation2 + $0x2e]]  ;;  %s679_s4 = sld [smem:[#allocation2 + $0x31]] }
  0x25   :  { %v655_v4 = vmax.f32 %v85_v57, 0.0  ;;  %v111_v5 = vadd.f32 %v107_v58, %v104_v55  ;;  %v119_v6 = vmul.f32 %v118_v63, %v537_v1  ;;  %v122_v7 = vmul.f32 %v121_v0, %v544_v2  ;;  %s687_s5 = sld [smem:[#allocation2 + $0x34]]  ;;  %s689_s0 = sld [smem:[#allocation2 + $0x37]] }
  0x26   :  { %v100_v8 = vadd.f32 %v99_v51, %v97_v61  ;;  %v124_v9 = vstv %s608_s16  ;;  %v129_v10 = vstv %s613_s1  ;;  %v133_v11 = vstv %s615_s17  ;;  %s694_s6 = sld [smem:[#allocation2 + $0x3a]]  ;;  %s700_s7 = sld [smem:[#allocation2 + $0x3d]] }
  0x27   :  { %v112_v12 = vadd.f32 %v111_v5, %v110_v62  ;;  %v125_v13 = vmul.f32 %v124_v9, %v553_v3  ;;  %v126_v14 = vadd.f32 %v122_v7, %v119_v6  ;;  %v134_v15 = vmul.f32 %v133_v11, %v537_v1  ;;  %s702_s8 = sld [smem:[#allocation2 + $0x40]]  ;;  %s708_s9 = sld [smem:[#allocation2 + $0x43]] }
  0x28   :  { %v672_v16 = vmax.f32 %v100_v8, 0.0  ;;  %v136_v17 = vstv %s620_s18  ;;  %v139_v18 = vstv %s626_s19  ;;  %v144_v19 = vstv %s628_s20  ;;  %s715_s10 = sld [smem:[#allocation2 + $0x29]]  ;;  %s717_s11 = sld [smem:[#allocation2 + $0x2c]] }
  0x29   :  { %v115_v20 = vadd.f32 %v114_v60, %v112_v12  ;;  %v127_v21 = vadd.f32 %v126_v14, %v125_v13  ;;  %v137_v22 = vmul.f32 %v136_v17, %v544_v2  ;;  %v140_v23 = vmul.f32 %v139_v18, %v553_v3  ;;  %s722_s12 = sld [smem:[#allocation2 + $0x2f]]  ;;  %s728_s13 = sld [smem:[#allocation2 + $0x32]] }
  0x2a   :  { %v148_v24 = vstv %s633_s21  ;;  %v151_v25 = vstv %s635_s22  ;;  %v154_v26 = vstv %s641_s23  ;;  %v159_v27 = vstv %s643_s24  ;;  %s730_s14 = sld [smem:[#allocation2 + $0x35]]  ;;  %s735_s15 = sld [smem:[#allocation2 + $0x38]] }
  0x2b   :  { %v691_v28 = vmax.f32 %v115_v20, 0.0  ;;  %v130_v29 = vadd.f32 %v129_v10, %v127_v21  ;;  %v141_v30 = vadd.f32 %v137_v22, %v134_v15  ;;  %v149_v31 = vmul.f32 %v148_v24, %v537_v1  ;;  %s737_s16 = sld [smem:[#allocation2 + $0x3b]]  ;;  %s742_s1 = sld [smem:[#allocation2 + $0x3e]] }
  0x2c   :  { %v152_v32 = vmul.f32 %v151_v25, %v544_v2  ;;  %v155_v33 = vmul.f32 %v154_v26, %v553_v3  ;;  %v163_v34 = vstv %s651_s25  ;;  %v166_v35 = vstv %s653_s26  ;;  %s749_s17 = sld [smem:[#allocation2 + $0x41]]  ;;  %s751_s18 = sld [smem:[#allocation2 + $0x44]] }
  0x2d   :  { %v704_v36 = vmax.f32 %v130_v29, 0.0  ;;  %v142_v38 = vadd.f32 %v141_v30, %v140_v23  ;;  %v164_v39 = vmul.f32 %v163_v34, %v537_v1  ;;  %v167_v40 = vmul.f32 %v166_v35, %v544_v2  ;;  %s757_s19 = sld [smem:[#allocation2 + $0x46]]  ;;  %s760_s20 = sld [smem:[#allocation2 + $0x2a]] }
  0x2e   :  { %v156_v41 = vadd.f32 %v152_v32, %v149_v31  ;;  %v169_v42 = vstv %s659_s27  ;;  %v174_v43 = vstv %s664_s28  ;;  %v178_v44 = vstv %s666_s29  ;;  %s765_s21 = sld [smem:[#allocation2 + $0x47]]  ;;  %s767_s22 = sld [smem:[#allocation2 + $0x2d]] }
  0x2f   :  { %v145_v46 = vadd.f32 %v144_v19, %v142_v38  ;;  %v170_v47 = vmul.f32 %v169_v42, %v553_v3  ;;  %v171_v48 = vadd.f32 %v167_v40, %v164_v39  ;;  %v179_v49 = vmul.f32 %v178_v44, %v610_v37  ;;  %s772_s23 = sld [smem:[#allocation2 + $0x30]]  ;;  %s774_s24 = sld [smem:[#allocation2 + $0x33]] }
  0x30   :  { %v157_v1 = vadd.f32 %v156_v41, %v155_v33  ;;  %v181_v2 = vstv %s670_s30  ;;  %v184_v50 = vstv %s677_s3  ;;  %v187_v51 = vstv %s679_s4  ;;  %s778_s25 = sld [smem:[#allocation2 + $0x36]]  ;;  %s780_s26 = sld [smem:[#allocation2 + $0x39]] }
  0x31   :  { %v724_v52 = vmax.f32 %v145_v46, 0.0  ;;  %v172_v54 = vadd.f32 %v171_v48, %v170_v47  ;;  %v182_v3 = vmul.f32 %v181_v2, %v622_v45  ;;  %v185_v55 = vmul.f32 %v184_v50, %v637_v53  ;;  %s786_s27 = sld [smem:[#allocation2 + $0x3c]]  ;;  %s788_s28 = sld [smem:[#allocation2 + $0x3f]] }
  0x32   :  { %v160_v56 = vadd.f32 %v159_v27, %v157_v1  ;;  %v188_v57 = vmul.f32 %v187_v51, %v655_v4  ;;  %v190_v58 = vstv %s687_s5  ;;  %v193_v59 = vstv %s689_s0  ;;  %s796_s29 = sld [smem:[#allocation2 + $0x42]]  ;;  %s798_s30 = sld [smem:[#allocation2 + $0x45]] }
  0x33   :  { %v175_v60 = vadd.f32 %v174_v43, %v172_v54  ;;  %v191_v61 = vmul.f32 %v190_v58, %v672_v16  ;;  %v194_v62 = vmul.f32 %v193_v59, %v691_v28  ;;  %v196_v63 = vstv %s694_s6  ;;  %s807_s3 = sld [smem:[#allocation2 + $0x4a]]  ;;  %s812_s4 = sld [smem:[#allocation2 + $0x49]] }
  0x34   :  { %v744_v0 = vmax.f32 %v160_v56, 0.0  ;;  %v197_v5 = vmul.f32 %v196_v63, %v704_v36  ;;  %v199_v6 = vstv %s700_s7  ;;  %v202_v7 = vstv %s702_s8  ;;  %s490_s5 = sld [smem:[#allocation2 + $0x48]]  ;;  %s493_s0 = sld [smem:[#allocation2 + $0x4b]] }
  0x35   :  { %v753_v8 = vmax.f32 %v175_v60, 0.0  ;;  %v200_v9 = vmul.f32 %v199_v6, %v724_v52  ;;  %v205_v10 = vstv %s708_s9  ;;  %v207_v11 = vadd.f32 %v182_v3, %v179_v49 }
  0x36   :  { %v203_v12 = vmul.f32 %v202_v7, %v744_v0  ;;  %v208_v13 = vadd.f32 %v188_v57, %v185_v55  ;;  %v209_v14 = vadd.f32 %v194_v62, %v191_v61  ;;  %v220_v18 = vstv %s715_s10 }
  0x37   :  { %v206_v15 = vmul.f32 %v205_v10, %v753_v8  ;;  %v210_v17 = vadd.f32 %v200_v9, %v197_v5  ;;  %v223_v19 = vstv %s717_s11  ;;  %v221_v21 = vmul.f32 %v220_v18, %v610_v37 }
  0x38   :  { %v212_v20 = vadd.f32 %v208_v13, %v207_v11  ;;  %v224_v22 = vmul.f32 %v223_v19, %v622_v45  ;;  %v226_v23 = vstv %s722_s12  ;;  %v229_v27 = vstv %s728_s13 }
  0x39   :  { %v211_v24 = vadd.f32 %v206_v15, %v203_v12  ;;  %v213_v25 = vadd.f32 %v210_v17, %v209_v14  ;;  %v227_v26 = vmul.f32 %v226_v23, %v637_v53  ;;  %v230_v29 = vmul.f32 %v229_v27, %v655_v4 }
  0x3a   :  { %v232_v30 = vstv %s730_s14  ;;  %v235_v31 = vstv %s735_s15  ;;  %v238_v32 = vstv %s737_s16  ;;  %v241_v39 = vstv %s742_s1 }
  0x3b   :  { %v214_v33 = vadd.f32 %v213_v25, %v212_v20  ;;  %v233_v34 = vmul.f32 %v232_v30, %v672_v16  ;;  %v236_v35 = vmul.f32 %v235_v31, %v691_v28  ;;  %v239_v38 = vmul.f32 %v238_v32, %v704_v36 }
  0x3c   :  { %v244_v40 = vstv %s749_s17  ;;  %v247_v41 = vstv %s751_s18  ;;  %v249_v42 = vadd.f32 %v224_v22, %v221_v21  ;;  %v217_v43 = vstv %s757_s19 }
  0x3d   :  { %v242_v44 = vmul.f32 %v241_v39, %v724_v52  ;;  %v245_v46 = vmul.f32 %v244_v40, %v744_v0  ;;  %v248_v47 = vmul.f32 %v247_v41, %v753_v8  ;;  %v215_v48 = vadd.f32 %v214_v33, %v211_v24 }
  0x3e   :  { %v250_v49 = vadd.f32 %v230_v29, %v227_v26  ;;  %v251_v1 = vadd.f32 %v236_v35, %v233_v34  ;;  %v262_v2 = vstv %s760_s20  ;;  %v259_v54 = vstv %s765_s21 }
  0x3f   :  { %v252_v50 = vadd.f32 %v242_v44, %v239_v38  ;;  %v253_v51 = vadd.f32 %v248_v47, %v245_v46  ;;  %v263_v3 = vmul.f32 %v262_v2, %v610_v37  ;;  %v265_v56 = vstv %s767_s22 }
  0x40   :  { %v254_v55 = vadd.f32 %v250_v49, %v249_v42  ;;  %v268_v57 = vstv %s772_s23  ;;  %v271_v58 = vstv %s774_s24  ;;  %v266_v60 = vmul.f32 %v265_v56, %v622_v45 }
  0x41   :  { %v255_v59 = vadd.f32 %v252_v50, %v251_v1  ;;  %v269_v61 = vmul.f32 %v268_v57, %v637_v53  ;;  %v272_v62 = vmul.f32 %v271_v58, %v655_v4  ;;  %v274_v63 = vstv %s778_s25 }
  0x42   :  { %v277_v5 = vstv %s780_s26  ;;  %v280_v37 = vstv %s786_s27  ;;  %v283_v6 = vstv %s788_s28  ;;  %v275_v9 = vmul.f32 %v274_v63, %v672_v16 }
  0x43   :  { %v256_v7 = vadd.f32 %v255_v59, %v254_v55  ;;  %v278_v10 = vmul.f32 %v277_v5, %v691_v28  ;;  %v281_v11 = vmul.f32 %v280_v37, %v704_v36  ;;  %v284_v12 = vmul.f32 %v283_v6, %v724_v52 }
  0x44   :  { %v286_v45 = vstv %s796_s29  ;;  %v289_v53 = vstv %s798_s30  ;;  %v291_v13 = vadd.f32 %v266_v60, %v263_v3  ;;  %v292_v17 = vadd.f32 %v272_v62, %v269_v61 }
  0x45   :  { %v257_v4 = vadd.f32 %v256_v7, %v253_v51  ;;  %v287_v14 = vmul.f32 %v286_v45, %v744_v0  ;;  %v290_v15 = vmul.f32 %v289_v53, %v753_v8  ;;  %v829_v16 = vadd.f32 %v217_v43, %v215_v48 }
  0x46   :  { %v293_v28 = vadd.f32 %v278_v10, %v275_v9  ;;  %v294_v18 = vadd.f32 %v284_v12, %v281_v11  ;;  %v296_v19 = vadd.f32 %v292_v17, %v291_v13  ;;  %v834_v20 = vstv %s807_s3 }
  0x47   :  { %v831_v36 = vadd.f32 %v259_v54, %v257_v4  ;;  %v295_v52 = vadd.f32 %v290_v15, %v287_v14  ;;  %v837_v22 = vstv %s812_s4  ;;  %v310_v8 = vmul.f32 %v834_v20, %v829_v16 }
  0x48   :  { %v297_v21 = vadd.f32 %v294_v18, %v293_v28  ;;  %v301_v24 = vstv %s490_s5  ;;  %v315_v27 = vstv %s493_s0 }
  0x49   :  { %v306_v0 = vsub.f32 %v831_v36, %v829_v16  ;;  %v311_v31 = vsub.f32 %v310_v8, %v831_v36  ;;  %v314_v32 = vmul.f32 %v831_v36, %v829_v16 }
  0x4a   :  { %v298_v23 = vadd.f32 %v297_v21, %v296_v19 }
  0x4b   :  { %v308_v25 = vmul.f32 %v837_v22, %v306_v0 }
  0x4c   :  { %v299_v26 = vadd.f32 %v298_v23, %v295_v52 }
  0x4d   :  { %v318_v29 = vmul.f32 0.1, %v308_v25 }
  0x4e   :  { %v844_v30 = vadd.f32 %v301_v24, %v299_v26 }
  0x4f   :  { %v320_v33 = vmul.f32 0.5, %v318_v29 }
  0x50   :  { %v312_v34 = vmul.f32 %v844_v30, %v829_v16  ;;  %v316_v35 = vmul.f32 %v315_v27, %v844_v30 }
  0x51   :  { %v321_v40 = vadd.f32 %v320_v33, %v829_v16 }
  0x52   :  { %v313_v38 = vsub.f32 %v311_v31, %v312_v34  ;;  %v317_v39 = vsub.f32 %v314_v32, %v316_v35 }
  0x53   :  { %v330_v46 = vmul.f32 %v321_v40, %v834_v20 }
  0x54   :  { %v322_v41 = vmul.f32 0.1, %v313_v38  ;;  %v325_v42 = vmul.f32 0.1, %v317_v39 }
  0x56   :  { %v323_v43 = vmul.f32 0.5, %v322_v41  ;;  %v326_v44 = vmul.f32 0.5, %v325_v42 }
  0x58   :  { %v324_v47 = vadd.f32 %v323_v43, %v831_v36  ;;  %v327_v48 = vadd.f32 %v326_v44, %v844_v30 }
  0x5a   :  { %v328_v49 = vsub.f32 %v324_v47, %v321_v40  ;;  %v331_v1 = vsub.f32 %v330_v46, %v324_v47  ;;  %v332_v2 = vmul.f32 %v327_v48, %v321_v40  ;;  %v334_v50 = vmul.f32 %v324_v47, %v321_v40 }
  0x5b   :  { %v335_v51 = vmul.f32 %v327_v48, %v315_v27 }
  0x5c   :  { %v329_v54 = vmul.f32 %v328_v49, %v837_v22  ;;  %v333_v3 = vsub.f32 %v331_v1, %v332_v2 }
  0x5d   :  { %v336_v55 = vsub.f32 %v334_v50, %v335_v51 }
  0x5e   :  { %v337_v56 = vmul.f32 0.1, %v329_v54  ;;  %v340_v57 = vmul.f32 0.1, %v333_v3  ;;  %v370_v7 = vmul.f32 2.0, %v329_v54  ;;  %v386_v13 = vmul.f32 2.0, %v333_v3 }
  0x5f   :  { %v343_v58 = vmul.f32 0.1, %v336_v55  ;;  %v400_v12 = vmul.f32 2.0, %v336_v55 }
  0x60   :  { %v338_v59 = vmul.f32 0.5, %v337_v56  ;;  %v341_v60 = vmul.f32 0.5, %v340_v57  ;;  %v371_v17 = vadd.f32 %v370_v7, %v308_v25  ;;  %v387_v23 = vadd.f32 %v386_v13, %v313_v38 }
  0x61   :  { %v344_v61 = vmul.f32 0.5, %v343_v58  ;;  %v401_v19 = vadd.f32 %v400_v12, %v317_v39 }
  0x62   :  { %v339_v62 = vadd.f32 %v338_v59, %v829_v16  ;;  %v342_v63 = vadd.f32 %v341_v60, %v831_v36 }
  0x63   :  { %v345_v5 = vadd.f32 %v344_v61, %v844_v30 }
  0x64   :  { %v346_v37 = vsub.f32 %v342_v63, %v339_v62  ;;  %v348_v6 = vmul.f32 %v339_v62, %v834_v20  ;;  %v352_v9 = vmul.f32 %v342_v63, %v339_v62 }
  0x65   :  { %v350_v10 = vmul.f32 %v345_v5, %v339_v62  ;;  %v353_v11 = vmul.f32 %v345_v5, %v315_v27 }
  0x66   :  { %v347_v45 = vmul.f32 %v346_v37, %v837_v22  ;;  %v349_v53 = vsub.f32 %v348_v6, %v342_v63 }
  0x67   :  { %v354_v4 = vsub.f32 %v352_v9, %v353_v11 }
  0x68   :  { %v351_v14 = vsub.f32 %v349_v53, %v350_v10  ;;  %v355_v15 = vmul.f32 0.1, %v347_v45  ;;  %v372_v28 = vmul.f32 2.0, %v347_v45 }
  0x69   :  { %v359_v18 = vmul.f32 0.1, %v354_v4  ;;  %v402_v52 = vmul.f32 2.0, %v354_v4 }
  0x6a   :  { %v356_v21 = vadd.f32 %v355_v15, %v829_v16  ;;  %v357_v0 = vmul.f32 0.1, %v351_v14  ;;  %v388_v8 = vmul.f32 2.0, %v351_v14  ;;  %v373_v31 = vadd.f32 %v372_v28, %v371_v17 }
  0x6b   :  { %v360_v24 = vadd.f32 %v359_v18, %v844_v30  ;;  %v403_v33 = vadd.f32 %v402_v52, %v401_v19 }
  0x6c   :  { %v358_v26 = vadd.f32 %v357_v0, %v831_v36  ;;  %v363_v29 = vmul.f32 %v356_v21, %v834_v20  ;;  %v389_v39 = vadd.f32 %v388_v8, %v387_v23 }
  0x6d   :  { %v368_v32 = vmul.f32 %v360_v24, %v315_v27  ;;  %v365_v34 = vmul.f32 %v360_v24, %v356_v21 }
  0x6e   :  { %v361_v25 = vsub.f32 %v358_v26, %v356_v21  ;;  %v367_v35 = vmul.f32 %v358_v26, %v356_v21  ;;  %v364_v40 = vsub.f32 %v363_v29, %v358_v26 }
  0x70   :  { %v362_v41 = vmul.f32 %v361_v25, %v837_v22  ;;  %v369_v42 = vsub.f32 %v367_v35, %v368_v32  ;;  %v366_v43 = vsub.f32 %v364_v40, %v365_v34 }
  0x72   :  { %v374_v38 = vadd.f32 %v373_v31, %v362_v41  ;;  %v404_v44 = vadd.f32 %v403_v33, %v369_v42  ;;  %v390_v46 = vadd.f32 %v389_v39, %v366_v43 }
  0x74   :  { %v375_v47 = vmul.f32 0.1, %v374_v38  ;;  %v405_v48 = vmul.f32 0.1, %v404_v44  ;;  %v391_v49 = vmul.f32 0.1, %v390_v46 }
  0x76   :  { %v377_v1 = vmul.f32 0.16666667, %v375_v47  ;;  %v406_v20 = vmul.f32 0.16666667, %v405_v48  ;;  %v392_v27 = vmul.f32 0.16666667, %v391_v49 }
  0x78   :  { %380 = vperm.xlu0 %496, %v377_v1   ;;  %409 = vperm.xlu1 %497, %v406_v20  }
  0x7c   :  { %395 = vperm.xlu0 %496, %v392_v27  }
  0xf7   :  { %v381_v2 = vpop.permute.xlu0 %380  ;;  %v410_v50 = vpop.permute.xlu1 %409 }
  0xf8   :  { %v383_v51 = vadd.f32 %v381_v2, %v829_v16  ;;  %v412_v22 = vadd.f32 %v410_v50, %v844_v30 }
  0xfa   :  { %385 = vst.msk [vmem:[%s881_s2] sm:$0x1] %vm384_vm0, %v383_v51  ;;  %413 = vst.msk [vmem:[%s881_s2 + $0x2] sm:$0x1] %vm384_vm0, %v412_v22 }
  0xfb   :  { %v396_v54 = vpop.permute.xlu0 %395 }
  0xfc   :  { %v398_v3 = vadd.f32 %v396_v54, %v831_v36 }
  0xfe   :  { %399 = vst.msk [vmem:[%s881_s2 + $0x1] sm:$0x1] %vm384_vm0, %v398_v3 }
  0xff   :  { %418 = vsyncpa [#allocation3], 1 }

</bundles_post_ra>
